<compile_context>
chip_gen: v7x
topology: tpu7x:2x2x1
jax: 0.10.0
libtpu: 0.0.40
codegen_flags: <defaults>
</compile_context>

<pallas_src>
import jax
import jax.numpy as jnp
from jax.experimental import pallas as pl
from jax.experimental.pallas import tpu as pltpu


def _round_up(x, m):
    return ((x + m - 1) // m) * m


def _vmem_capacity_bytes():
    # Generation-aware VMEM capacity (v5e/v6e: 128 MiB, v7x: 64 MiB per TC).
    try:
        return int(pltpu.get_tpu_info().vmem_capacity_bytes)
    except Exception:
        return 128 * 1024 * 1024


# ---------------------------------------------------------------------------
# Path A: VMEM-resident table + K-chunked one-hot MXU gather.
# ---------------------------------------------------------------------------

def _make_onehot_kernel(k_chunk, num_k):
    def kernel(ids_ref, table_ref, out_ref, acc_ref):
        g = out_ref.shape[0]
        ids = ids_ref[...]                                    # (G, 1) int32
        acc_ref[...] = jnp.zeros_like(acc_ref)

        @pl.loop(0, num_k)
        def _(k):
            base = pl.multiple_of(k * k_chunk, k_chunk)
            iota = jax.lax.broadcasted_iota(jnp.int32, (g, k_chunk), 1) + base
            one_hot = (iota == ids).astype(table_ref.dtype)   # (G, k_chunk)
            chunk = table_ref[pl.ds(base, k_chunk), :]        # (k_chunk, ED_p)
            acc_ref[...] += jnp.dot(
                one_hot, chunk, preferred_element_type=jnp.float32
            )

        out_ref[...] = acc_ref[...].astype(out_ref.dtype)

    return kernel


def _onehot_lookup(flat_ids, table, embed_dim_p, group_size, vmem_cap):
    batch = flat_ids.shape[0]
    num_users, embed_dim = table.shape
    itemsize = table.dtype.itemsize

    # K chunk: >=128 (lane-dense one-hot, full MXU K pass), <=512 to bound the
    # per-chunk (G, k_chunk) intermediates to well under 1 MiB.
    k_chunk = min(512, _round_up(num_users, 128))
    num_users_p = _round_up(num_users, k_chunk)
    num_k = num_users_p // k_chunk

    table_p = table
    if (num_users_p, embed_dim_p) != (num_users, embed_dim):
        table_p = jnp.pad(
            table, ((0, num_users_p - num_users), (0, embed_dim_p - embed_dim))
        )

    # G rows (>=8, multiple of 8) per grid step.
    batch_p = _round_up(max(batch, 1), 8)
    g = min(group_size, batch_p)
    batch_p = _round_up(batch_p, g)
    num_blocks = batch_p // g
    ids_p = jnp.zeros((batch_p, 1), jnp.int32).at[:batch, 0].set(flat_ids)

    # VMEM accounting: single-buffered resident table + double-buffered
    # ids/out blocks + f32 accumulator + per-chunk one-hot/iota intermediates.
    table_bytes = num_users_p * embed_dim_p * itemsize
    io_bytes = 2 * (g * embed_dim_p * itemsize) + 2 * (g * 128 * 4)
    acc_bytes = g * embed_dim_p * 4
    interm_bytes = 3 * g * k_chunk * 4
    need = table_bytes + io_bytes + acc_bytes + interm_bytes
    vmem_limit = min(vmem_cap, max(32 << 20, int(1.3 * need)))

    out = pl.pallas_call(
        _make_onehot_kernel(k_chunk, num_k),
        out_shape=jax.ShapeDtypeStruct((batch_p, embed_dim_p), table.dtype),
        grid_spec=pltpu.PrefetchScalarGridSpec(
            num_scalar_prefetch=0,
            grid=(num_blocks,),
            in_specs=[
                # (G, 1) id block per grid step.
                pl.BlockSpec((g, 1), lambda i: (i, 0)),
                # Whole padded table resident in VMEM, single-buffered:
                # exactly one HBM->VMEM copy for the entire call.
                pl.BlockSpec(memory_space=pltpu.MemorySpace.VMEM),
            ],
            out_specs=pl.BlockSpec((g, embed_dim_p), lambda i: (i, 0)),
            scratch_shapes=[pltpu.VMEM((g, embed_dim_p), jnp.float32)],
        ),
        compiler_params=pltpu.CompilerParams(
            dimension_semantics=("parallel",),
            vmem_limit_bytes=vmem_limit,
        ),
    )(ids_p, table_p)
    return out[:batch, :embed_dim]


# ---------------------------------------------------------------------------
# Path B: direct row gather via scalar prefetch + data-dependent index_map.
# ---------------------------------------------------------------------------

def _row_gather_kernel(ids_ref, row_ref, out_ref):
    del ids_ref  # row selection already happened in the index_map (SMEM ids)
    out_ref[...] = row_ref[...]


def _gather_lookup(flat_ids, table, embed_dim_p):
    batch = flat_ids.shape[0]
    num_users, embed_dim = table.shape
    table_p = table
    if embed_dim_p != embed_dim:
        table_p = jnp.pad(table, ((0, 0), (0, embed_dim_p - embed_dim)))

    out = pl.pallas_call(
        _row_gather_kernel,
        out_shape=jax.ShapeDtypeStruct((batch, embed_dim_p), table.dtype),
        grid_spec=pltpu.PrefetchScalarGridSpec(
            num_scalar_prefetch=1,           # ids land in SMEM, drive index_map
            grid=(batch,),
            in_specs=[
                pl.BlockSpec((1, embed_dim_p), lambda i, ids: (ids[i], 0)),
            ],
            out_specs=pl.BlockSpec((1, embed_dim_p), lambda i, ids: (i, 0)),
        ),
        compiler_params=pltpu.CompilerParams(
            dimension_semantics=("arbitrary",),
        ),
    )(flat_ids, table_p)
    return out[:, :embed_dim]


# ---------------------------------------------------------------------------
# Public wrapper (== UserEmbeddingLayer.forward).
# ---------------------------------------------------------------------------

def user_embedding_lookup(user_inputs, embedding_table, *, group_size=256,
                          method=None):
    """Equivalent of torch.nn.Embedding(num_users, embedding_dim)(user_inputs).

    Out-of-range ids are clamped into [0, num_users-1] (PyTorch raises).
    method: None (auto), "onehot" (resident-table MXU gather) or "gather"
    (scalar-prefetch direct row gather).
    """
    orig_shape = user_inputs.shape
    flat_ids = user_inputs.reshape(-1).astype(jnp.int32)
    batch = flat_ids.shape[0]
    num_users, embed_dim = embedding_table.shape
    embed_dim_p = _round_up(embed_dim, 128)

    if batch == 0:
        return jnp.zeros(orig_shape + (embed_dim,), embedding_table.dtype)

    flat_ids = jnp.clip(flat_ids, 0, num_users - 1)

    vmem_cap = _vmem_capacity_bytes()
    # Resident-table budget: leave >half of VMEM for blocks/intermediates on
    # v7x (64 MiB/TC), cap at 56 MiB on v5e/v6e (128 MiB physical).
    resident_budget = min(int(0.45 * vmem_cap), 56 * 1024 * 1024)

    if method is None:
        table_bytes = (_round_up(num_users, 128) * embed_dim_p
                       * embedding_table.dtype.itemsize)
        too_big = table_bytes > resident_budget
        tiny_batch = num_users > 8 * batch   # gathered rows << full-table read
        method = "gather" if (too_big or tiny_batch) else "onehot"

    if method == "gather":
        out = _gather_lookup(flat_ids, embedding_table, embed_dim_p)
    else:
        out = _onehot_lookup(flat_ids, embedding_table, embed_dim_p,
                             group_size, vmem_cap)

    return out.reshape(orig_shape + (embed_dim,))


if __name__ == "__main__":
    key = jax.random.PRNGKey(0)
    k_emb1, k_idx1, k_emb2, k_idx2 = jax.random.split(key, 4)

    # Case 1: small table, 2-D index batch -> resident one-hot MXU path.
    num_users, embedding_dim = 16, 128
    table = jax.random.normal(k_emb1, (num_users, embedding_dim), dtype=jnp.float32)
    user_inputs = jax.random.randint(k_idx1, (2, 4), 0, num_users, dtype=jnp.int32)
    out = user_embedding_lookup(user_inputs, table)
    jax.block_until_ready(out)
    ref = jnp.take(table, user_inputs, axis=0)
    assert out.shape == (2, 4, embedding_dim)
    assert jnp.allclose(out, ref), "one-hot path mismatch vs reference"

    # Case 2: many users, tiny batch, non-x128 embed dim -> direct gather path.
    num_users2, embedding_dim2 = 1000, 96
    table2 = jax.random.normal(k_emb2, (num_users2, embedding_dim2), dtype=jnp.float32)
    user_inputs2 = jax.random.randint(k_idx2, (5,), 0, num_users2, dtype=jnp.int32)
    out2 = user_embedding_lookup(user_inputs2, table2)
    jax.block_until_ready(out2)
    ref2 = jnp.take(table2, user_inputs2, axis=0)
    assert out2.shape == (5, embedding_dim2)
    assert jnp.array_equal(out2, ref2), "gather path mismatch vs reference"

    print("KERNEL_OK")
</pallas_src>

<mosaic_0001>
module attributes {stable_mosaic.version = 11 : i64} {
  func.func @kernel(%arg0: i32, %arg1: memref<8x1xi32, #tpu.memory_space<vmem>>, %arg2: memref<128x128xf32, #tpu.memory_space<vmem>>, %arg3: memref<8x128xf32, #tpu.memory_space<vmem>>, %arg4: memref<8x128xf32, #tpu.memory_space<vmem>>) attributes {dimension_semantics = [#tpu.dimension_semantics<parallel>], iteration_bounds = array<i64: 1>, scalar_prefetch = 0 : i64, scratch_operands = 1 : i64, tpu.core_type = #tpu.core_type<tc>, window_params = [{transform_indices = @transform_0, window_bounds = array<i64: 8, 1>}, {pipeline_mode = #tpu.pipeline_mode<synchronous>, transform_indices = @transform_1, window_bounds = array<i64: 128, 128>}, {transform_indices = @transform_2, window_bounds = array<i64: 8, 128>}]} {
    %c0 = arith.constant 0 : index
    %c0_0 = arith.constant 0 : index
    %0 = vector.load %arg1[%c0, %c0_0] : memref<8x1xi32, #tpu.memory_space<vmem>>, vector<8x1xi32>
    %cst = arith.constant 0.000000e+00 : f32
    %1 = vector.broadcast %cst : f32 to vector<8x128xf32>
    %c0_1 = arith.constant 0 : index
    %c0_2 = arith.constant 0 : index
    %2 = vector.load %arg4[%c0_1, %c0_2] : memref<8x128xf32, #tpu.memory_space<vmem>>, vector<8x128xf32>
    tpu.vector_store %arg4[%c0_1, %c0_2], %1 {strides = array<i32>} : memref<8x128xf32, #tpu.memory_space<vmem>>, vector<8x128xf32>,
    %c0_i32 = arith.constant 0 : i32
    %c1_i32 = arith.constant 1 : i32
    %3 = arith.muli %c0_i32, %c1_i32 : i32
    %c0_i32_3 = arith.constant 0 : i32
    %4 = arith.addi %c0_i32_3, %3 : i32
    %c128_i32 = arith.constant 128 : i32
    %5 = arith.muli %4, %c128_i32 : i32
    %6 = tpu.assume_multiple %5, 128 : i32
    %7 = tpu.iota {dimensions = array<i32: 1>} : vector<8x128xi32>
    %8 = vector.broadcast %6 : i32 to vector<8x128xi32>
    %9 = arith.addi %7, %8 : vector<8x128xi32>
    %10 = vector.broadcast %0 : vector<8x1xi32> to vector<8x128xi32>
    %11 = arith.cmpi eq, %9, %10 : vector<8x128xi32>
    %12 = arith.extui %11 : vector<8x128xi1> to vector<8x128xi32>
    %13 = arith.sitofp %12 : vector<8x128xi32> to vector<8x128xf32>
    %14 = arith.index_cast %6 : i32 to index
    %c0_4 = arith.constant 0 : index
    %15 = vector.load %arg2[%14, %c0_4] : memref<128x128xf32, #tpu.memory_space<vmem>>, vector<128x128xf32>
    %c0_5 = arith.constant 0 : index
    %c0_6 = arith.constant 0 : index
    %16 = vector.load %arg4[%c0_5, %c0_6] : memref<8x128xf32, #tpu.memory_space<vmem>>, vector<8x128xf32>
    %cst_7 = arith.constant dense<0.000000e+00> : vector<8x128xf32>
    %17 = tpu.matmul %13, %15, %cst_7 {dimension_numbers = #tpu.dot_dimension_numbers<[1], [0], [0], [1], [0, 0, 1, 1], [], []>} : vector<8x128xf32>, vector<128x128xf32>, vector<8x128xf32> -> vector<8x128xf32>
    %18 = arith.addf %16, %17 : vector<8x128xf32>
    %c0_8 = arith.constant 0 : index
    %c0_9 = arith.constant 0 : index
    %19 = vector.load %arg4[%c0_8, %c0_9] : memref<8x128xf32, #tpu.memory_space<vmem>>, vector<8x128xf32>
    tpu.vector_store %arg4[%c0_8, %c0_9], %18 {strides = array<i32>} : memref<8x128xf32, #tpu.memory_space<vmem>>, vector<8x128xf32>,
    %c1_i32_10 = arith.constant 1 : i32
    %c0_11 = arith.constant 0 : index
    %c0_12 = arith.constant 0 : index
    %20 = vector.load %arg4[%c0_11, %c0_12] : memref<8x128xf32, #tpu.memory_space<vmem>>, vector<8x128xf32>
    %c0_13 = arith.constant 0 : index
    %c0_14 = arith.constant 0 : index
    %21 = vector.load %arg3[%c0_13, %c0_14] : memref<8x128xf32, #tpu.memory_space<vmem>>, vector<8x128xf32>
    tpu.vector_store %arg3[%c0_13, %c0_14], %20 {strides = array<i32>} : memref<8x128xf32, #tpu.memory_space<vmem>>, vector<8x128xf32>,
    return
  }
  func.func @transform_0(%arg0: i32) -> (i32, i32) {
    %c0_i32 = arith.constant 0 : i32
    %c0_i32_0 = arith.constant 0 : i32
    return %arg0, %c0_i32 : i32, i32
  }
  func.func @transform_1(%arg0: i32) -> (i32, i32) {
    %c0_i32 = arith.constant 0 : i32
    %c0_i32_0 = arith.constant 0 : i32
    %c0_i32_1 = arith.constant 0 : i32
    return %c0_i32, %c0_i32_0 : i32, i32
  }
  func.func @transform_2(%arg0: i32) -> (i32, i32) {
    %c0_i32 = arith.constant 0 : i32
    %c0_i32_0 = arith.constant 0 : i32
    return %arg0, %c0_i32 : i32, i32
  }
}

</mosaic_0001>

<bundles_post_ra>
// kernel: tpu_custom_call.1
= control target key start
LH: loop header
LB: loop body
LE: loop exit
PB: predicated region body
PF: predicated region fallthrough
CT: control target
= control target key end

     0   :  { %7 = vsyncpa [#allocation4], 0  ;;  %s331_s0 = inlined_call_operand.vmem [shape: s32[8,1], index: 0, kind: input, shape index: {}]   ;;  %s332_s1 = inlined_call_operand.hbm [shape: f32[128,128], index: 1, kind: input, shape index: {}]   ;;  %s333_s2 = inlined_call_operand.hbm [shape: f32[8,128], index: 2, kind: output, shape index: {}]  }
   0x1   :  { %8 = vsyncpa [#allocation5], 0  ;;  %s280_s9 = smov [#allocation3]   ;;  %s232_s13 = scalar_lea.hbm %s332_s1, 2048 }
   0x2   :  { %s16_s10 = sshll.u32 %s280_s9, 4  ;;  %p233_p0 = scmp.ne.s32.totalorder %s332_s1, %s232_s13  ;;  %s17_s10 = int_to_ptr.vmem [resolvable:$true] %s16_s10 }
   0x3   :  { %p236_p1 = scmp.lt.u32.totalorder %s232_s13, %s332_s1 }
   0x5   :  { %p238_p2 = pnand %p236_p1, %p233_p0 }
   0x7   :  { %241 = shalt.err (!%p238_p2)
}
   0x8   :  { %s242_s18 = scalar_lea.vmem %s17_s10, 2048  ;;  %p247_p4 = scmp.lt.s32.totalorder %s17_s10, %s17_s10 }
   0x9   :  { %p243_p3 = scmp.ne.s32.totalorder %s17_s10, %s242_s18  ;;  %p248_p5 = scmp.lt.s32.totalorder %s242_s18, %s242_s18 }
   0xb   :  { %p249_p6 = por %p248_p5, %p247_p4 }
   0xd   :  { %p250_p7 = pnand %p249_p6, %p243_p3 }
   0xf   :  { %253 = shalt.err (!%p250_p7)
}
  0x10   :  { %s281_s19 = smov 128   ;;  %s282_s20 = smov 8  }
  0x11   :  { %22 = dma.hbm_to_vmem [thread:$0]  %s332_s1, 2048, %s17_s10, [#allocation4], %s281_s19, %s281_s19, %s282_s20  }
  0x12   :  { %276 = dma.done.wait [#allocation4], 2048  }
  0x13   :  { %277 = vsyncadd [#allocation4], 4294965248  ;;  %v283_v0 = vmov 0   ;;  %v284_v1 = vmov 0.0|0.0   ;;  %v26_v2 = vld [vmem:[%s331_s0] sm:$0xff]  ;;  %v39_v4 = vld [vmem:[#allocation3 + $0x8] sm:$0xff]  ;;  %v28_v28 = vlaneseq }
  0x14   :  { %231 = vset.pattern.permute.xlu0 %v283_v0  ;;  %198 = vmatprep.subr.bf16.mxu0 %v284_v1  ;;  %v38_v3 = vld [vmem:[#allocation3] sm:$0xff]  ;;  %v40_v6 = vld [vmem:[#allocation3 + $0x10] sm:$0xff]  ;;  %v41_v7 = vld [vmem:[#allocation3 + $0x18] sm:$0xff]  ;;  %vm285_vm0 = vmmov 0   ;;  %v286_v8 = vmov 0.0   ;;  %v287_v31 = vmov 1.0  }
  0x15   :  { %33 = vperm.xlu0 %231, %v26_v2   ;;  %v199_v5 = vpack.c.bf16 %v39_v4, %v38_v3  ;;  %195 = vmatprep.mubr.msk.f32.mxu0 %vm285_vm0, %v286_v8  ;;  %v202_v9 = vpack.c.bf16 %v41_v7, %v40_v6  ;;  %v42_v10 = vld [vmem:[#allocation3 + $0x20] sm:$0xff]  ;;  %v43_v11 = vld [vmem:[#allocation3 + $0x28] sm:$0xff]  ;;  %v44_v13 = vld [vmem:[#allocation3 + $0x30] sm:$0xff]  ;;  %v29_v29 = vand.u32 127, %v28_v28  ;;  %s288_s0 = smov [#allocation6]  }
  0x16   :  { %v205_v12 = vpack.c.bf16 %v43_v11, %v42_v10  ;;  %v45_v14 = vld [vmem:[#allocation3 + $0x38] sm:$0xff]  ;;  %v46_v16 = vld [vmem:[#allocation3 + $0x40] sm:$0xff]  ;;  %v47_v17 = vld [vmem:[#allocation3 + $0x48] sm:$0xff]  ;;  %s135_s1 = sshll.u32 %s288_s0, 4  ;;  %s136_s1 = int_to_ptr.vmem [resolvable:$true] %s135_s1 }
  0x17   :  { %200 = vmatpush3.bf16.msra.mxu0 %v199_v5  ;;  %v208_v15 = vpack.c.bf16 %v45_v14, %v44_v13  ;;  %v211_v18 = vpack.c.bf16 %v47_v17, %v46_v16  ;;  %v48_v19 = vld [vmem:[#allocation3 + $0x50] sm:$0xff]  ;;  %v49_v20 = vld [vmem:[#allocation3 + $0x58] sm:$0xff]  ;;  %v50_v22 = vld [vmem:[#allocation3 + $0x60] sm:$0xff]  ;;  %s254_s25 = scalar_lea.vmem %s136_s1, 128  ;;  %p259_p9 = scmp.lt.s32.totalorder %s136_s1, %s136_s1 }
  0x18   :  { %201 = vmatprep.subr.bf16.mxu0 %v284_v1  ;;  %v214_v21 = vpack.c.bf16 %v49_v20, %v48_v19  ;;  %v51_v23 = vld [vmem:[#allocation3 + $0x68] sm:$0xff]  ;;  %v52_v25 = vld [vmem:[#allocation3 + $0x70] sm:$0xff]  ;;  %v53_v26 = vld [vmem:[#allocation3 + $0x78] sm:$0xff]  ;;  %p255_p8 = scmp.ne.s32.totalorder %s136_s1, %s254_s25  ;;  %p260_p10 = scmp.lt.s32.totalorder %s254_s25, %s254_s25 }
  0x19   :  { %v217_v24 = vpack.c.bf16 %v51_v23, %v50_v22  ;;  %v220_v27 = vpack.c.bf16 %v53_v26, %v52_v25 }
  0x1a   :  { %p261_p11 = por %p260_p10, %p259_p9 }
  0x1b   :  { %203 = vmatpush3.bf16.msra.mxu0 %v202_v9 }
  0x1c   :  { %204 = vmatprep.subr.bf16.mxu0 %v284_v1  ;;  %p262_p12 = pnand %p261_p11, %p255_p8 }
  0x1f   :  { %206 = vmatpush3.bf16.msra.mxu0 %v205_v12 }
  0x20   :  { %207 = vmatprep.subr.bf16.mxu0 %v284_v1 }
  0x23   :  { %209 = vmatpush3.bf16.msra.mxu0 %v208_v15 }
  0x24   :  { %210 = vmatprep.subr.bf16.mxu0 %v284_v1 }
  0x27   :  { %212 = vmatpush3.bf16.msra.mxu0 %v211_v18 }
  0x28   :  { %213 = vmatprep.subr.bf16.mxu0 %v284_v1 }
  0x2b   :  { %215 = vmatpush3.bf16.msra.mxu0 %v214_v21 }
  0x2c   :  { %216 = vmatprep.subr.bf16.mxu0 %v284_v1 }
  0x2f   :  { %218 = vmatpush3.bf16.msra.mxu0 %v217_v24 }
  0x30   :  { %219 = vmatprep.subr.bf16.mxu0 %v284_v1 }
  0x33   :  { %221 = vmatpush3.bf16.msra.mxu0 %v220_v27 }
  0x94   :  { %v34_v30 = vpop.permute.xlu0 %33 }
  0x95   :  { %vm35_vm1 = vcmp.eq.s32.totalorder %v29_v29, %v34_v30 }
  0x96   :  { %196 = vmatmul.mubr.msk.f32.vlgmr.msra.gmra.mrb[0].mxu0 %vm35_vm1, %v287_v31 }
 0x169   :  { %v121_v32 = vpop.f32.mrb[0].mxu0 }
 0x16a   :  { %128 = vst [vmem:[#allocation6] sm:$0xff] %v121_v32  ;;  %v197_v33 = vpop.f32.mrb[1].mxu0 }
 0x16b   :  { %265 = shalt.err (!%p262_p12)
}
 0x16c   :  { %s266_s28 = scalar_lea.hbm %s333_s2, 128 }
 0x16d   :  { %p267_p13 = scmp.ne.s32.totalorder %s333_s2, %s266_s28  ;;  %p270_p0 = scmp.lt.u32.totalorder %s266_s28, %s333_s2 }
 0x16f   :  { %p272_p1 = pnand %p270_p0, %p267_p13 }
 0x171   :  { %275 = shalt.err (!%p272_p1)
}
 0x172   :  { %138 = dma.vmem_to_hbm [thread:$0]  %s136_s1, 128, %s333_s2, [#allocation5]  }
 0x173   :  { %278 = dma.done.wait [#allocation5], 128  }
 0x174   :  { %279 = vsyncadd [#allocation5], 4294967168 }
 0x175   :  { %142 = vsyncpa [#allocation4], 1 }
 0x176   :  { %143 = vsyncpa [#allocation5], 1 }

</bundles_post_ra>
